<compile_context>
chip_gen: v7x
topology: tpu7x:2x2x1
jax: 0.10.0
libtpu: 0.0.40
codegen_flags: <defaults>
</compile_context>

<pallas_src>
import jax
import jax.numpy as jnp
from jax.experimental import pallas as pl
from jax.experimental.pallas import tpu as pltpu

HIDDEN_DIM = 128
NUM_CLASSES = 2


def _round_up(n, m):
    return ((n + m - 1) // m) * m


def mlp_kernel(x_ref, w1_ref, b1_ref, wd_ref, bd_ref, o_ref):
    # fc1 on the MXU: x arrives as f32 straight from HBM and is cast to bf16 on the
    # VPU (hidden under the x DMA); W1 is already bf16; accumulate in f32.
    x = x_ref[...].astype(jnp.bfloat16)
    h = jnp.dot(x, w1_ref[...], preferred_element_type=jnp.float32)      # (TM, H) f32
    # Bias + ReLU in f32 on the VPU.
    h = jnp.maximum(h + b1_ref[...], 0.0)

    # fc2 + 2-class softmax == sigmoid of the logit difference:
    #   z  = h @ (w2[:,1] - w2[:,0]) + (b2[1] - b2[0]);  p1 = sigmoid(z); p0 = 1 - p1
    # VPU broadcast-multiply + XLU lane-reduce instead of an N=2 MXU matmul; the exp
    # and the reciprocal go to the EUP (all free under the x DMA).
    z = jnp.sum(h * wd_ref[...], axis=-1, keepdims=True) + bd_ref[...]   # (TM, 1)
    p1 = pl.reciprocal(1.0 + jnp.exp(-z), approx=True)
    p1 = jnp.broadcast_to(p1, o_ref.shape)                               # (TM, 2)

    col = jax.lax.broadcasted_iota(jnp.int32, o_ref.shape, 1)
    o_ref[...] = jnp.where(col == 0, 1.0 - p1, p1).astype(o_ref.dtype)


def prepare_params(w1, b1, w2, b2):
    """One-time weight preprocessing, hoisted out of the per-inference-call path."""
    w1 = jnp.asarray(w1)
    H = w1.shape[1]
    w2 = jnp.asarray(w2, jnp.float32)
    b2 = jnp.asarray(b2, jnp.float32).reshape(-1)
    w1_bf16 = w1.astype(jnp.bfloat16)                 # MXU operand, resident in VMEM
    b1_f32 = jnp.asarray(b1, jnp.float32).reshape(1, H)
    wd = (w2[:, 1] - w2[:, 0]).reshape(1, H)          # softmax(2) == sigmoid(logit diff)
    bd = (b2[1] - b2[0]).reshape(1, 1)
    return w1_bf16, b1_f32, wd, bd


def _choose_tile_m(B, D, tile_m):
    if tile_m is None:
        # Double-buffered f32 x tile = 2 * tile_m * D * 4 B.  Keep it under ~8 MiB so
        # it fits comfortably on every chip generation while targeting 512-1024 rows
        # per grid step (~85% of HBM roofline for pipelined mem-bound kernels).
        budget = 8 << 20
        tile_m = min(1024, max(8, budget // max(1, 2 * D * 4)))
        # Keep >= 2 grid steps for large batches so v7x's two TensorCores (and its
        # full 3.2 TB/s HBM) are both used via dimension_semantics=("parallel",).
        if B > 128:
            tile_m = min(tile_m, _round_up(pl.cdiv(B, 2), 128))
    if tile_m >= B:
        return B                          # single full-batch block (always legal)
    if tile_m >= 128:
        return (tile_m // 128) * 128      # full MXU-M passes / fully packed vregs
    return max(8, (tile_m // 8) * 8)      # minimum legal sublane granularity


def mlp_forward_prepared(x, w1_bf16, b1, wd, bd, *, tile_m=None):
    x = jnp.asarray(x, jnp.float32)
    B, D = x.shape
    H = w1_bf16.shape[1]
    C = NUM_CLASSES
    assert w1_bf16.shape[0] == D and b1.shape == (1, H)
    assert wd.shape == (1, H) and bd.shape == (1, 1)

    tile_m = _choose_tile_m(B, D, tile_m)
    grid = (pl.cdiv(B, tile_m),)

    # Raise the scoped-VMEM limit only when this call actually needs more than the
    # most conservative default (v5e: 16 MiB); cap safely below v7x's 64 MiB physical.
    est = (2 * tile_m * D * 4                    # double-buffered f32 x tile
           + 2 * (D * H * 2 + 2 * H * 4 + 4)     # resident weights (worst case 2-buf)
           + 2 * tile_m * C * 4)                 # output blocks
    vmem_limit = None
    if est > (12 << 20):
        vmem_limit = int(min((est * 5) // 4 + (1 << 20), 56 << 20))

    out = pl.pallas_call(
        mlp_kernel,
        out_shape=jax.ShapeDtypeStruct((B, C), jnp.float32),
        grid_spec=pltpu.PrefetchScalarGridSpec(
            num_scalar_prefetch=0,
            grid=grid,
            in_specs=[
                pl.BlockSpec((tile_m, D), lambda i: (i, 0)),   # x tile (f32, streamed)
                pl.BlockSpec((D, H), lambda i: (0, 0)),        # W1 (bf16, resident)
                pl.BlockSpec((1, H), lambda i: (0, 0)),        # b1 (f32)
                pl.BlockSpec((1, H), lambda i: (0, 0)),        # w2[:,1]-w2[:,0] (f32)
                pl.BlockSpec((1, 1), lambda i: (0, 0)),        # b2[1]-b2[0]   (f32)
            ],
            out_specs=pl.BlockSpec((tile_m, C), lambda i: (i, 0)),
        ),
        compiler_params=pltpu.CompilerParams(
            dimension_semantics=("parallel",),
            vmem_limit_bytes=vmem_limit,
        ),
    )(x, w1_bf16, b1, wd, bd)
    return out


def mlp_forward(x, w1, b1, w2, b2, *, tile_m=None):
    """x:(B,D) f32, w1:(D,128), b1:(1,128), w2:(128,2), b2:(1,2) -> (B,2) softmax probs."""
    return mlp_forward_prepared(x, *prepare_params(w1, b1, w2, b2), tile_m=tile_m)


def init_params(key, input_dim, hidden_dim=HIDDEN_DIM, num_classes=NUM_CLASSES):
    # Deterministic init mimicking nn.Linear's uniform(-1/sqrt(fan_in), 1/sqrt(fan_in)).
    k1, k2, k3, k4 = jax.random.split(key, 4)
    lim1 = 1.0 / jnp.sqrt(input_dim)
    lim2 = 1.0 / jnp.sqrt(hidden_dim)
    w1 = jax.random.uniform(k1, (input_dim, hidden_dim), jnp.float32, -lim1, lim1)
    b1 = jax.random.uniform(k2, (1, hidden_dim), jnp.float32, -lim1, lim1)
    w2 = jax.random.uniform(k3, (hidden_dim, num_classes), jnp.float32, -lim2, lim2)
    b2 = jax.random.uniform(k4, (1, num_classes), jnp.float32, -lim2, lim2)
    return w1, b1, w2, b2


def _reference(x, w1, b1, w2, b2):
    h = jnp.maximum(x @ w1 + b1, 0.0)
    return jax.nn.softmax(h @ w2 + b2, axis=-1)


if __name__ == "__main__":
    key = jax.random.PRNGKey(0)

    # Test 1: small shapes matching the module (batch=16, input_dim=32), default tiling.
    kx, kp = jax.random.split(key)
    batch, input_dim = 16, 32
    x = jax.random.normal(kx, (batch, input_dim), dtype=jnp.float32)
    w1, b1, w2, b2 = init_params(kp, input_dim)
    out = jax.block_until_ready(mlp_forward(x, w1, b1, w2, b2))
    ref = _reference(x, w1, b1, w2, b2)
    assert out.shape == (batch, NUM_CLASSES)
    # bf16 matmul operands + approx reciprocal -> loosened tolerance vs pure-f32 ref.
    assert jnp.allclose(out, ref, atol=2e-2), float(jnp.max(jnp.abs(out - ref)))
    assert jnp.allclose(jnp.sum(out, axis=-1), 1.0, atol=1e-5)

    # Test 2: unaligned input_dim + explicit small tile (multi-step grid).
    kx2, kp2 = jax.random.split(jax.random.PRNGKey(1))
    batch2, input_dim2 = 48, 40
    x2 = jax.random.normal(kx2, (batch2, input_dim2), dtype=jnp.float32)
    p2 = init_params(kp2, input_dim2)
    out2 = jax.block_until_ready(mlp_forward(x2, *p2, tile_m=16))
    ref2 = _reference(x2, *p2)
    assert out2.shape == (batch2, NUM_CLASSES)
    assert jnp.allclose(out2, ref2, atol=2e-2), float(jnp.max(jnp.abs(out2 - ref2)))
    assert jnp.allclose(jnp.sum(out2, axis=-1), 1.0, atol=1e-5)

    # Test 3: batch that does not divide the auto-chosen tile (exercises partial edge
    # blocks + the hoisted prepare_params path), still tiny/fast.
    kx3, kp3 = jax.random.split(jax.random.PRNGKey(2))
    batch3, input_dim3 = 300, 64
    x3 = jax.random.normal(kx3, (batch3, input_dim3), dtype=jnp.float32)
    w13, b13, w23, b23 = init_params(kp3, input_dim3)
    prepared = prepare_params(w13, b13, w23, b23)
    out3 = jax.block_until_ready(mlp_forward_prepared(x3, *prepared))
    ref3 = _reference(x3, w13, b13, w23, b23)
    assert out3.shape == (batch3, NUM_CLASSES)
    assert jnp.allclose(out3, ref3, atol=2e-2), float(jnp.max(jnp.abs(out3 - ref3)))
    assert jnp.allclose(jnp.sum(out3, axis=-1), 1.0, atol=1e-5)

    print("KERNEL_OK")
</pallas_src>

<mosaic_0001>
module attributes {stable_mosaic.version = 11 : i64} {
  func.func @mlp_kernel(%arg0: i32, %arg1: memref<16x32xf32, #tpu.memory_space<vmem>>, %arg2: memref<32x128xbf16, #tpu.memory_space<vmem>>, %arg3: memref<1x128xf32, #tpu.memory_space<vmem>>, %arg4: memref<1x128xf32, #tpu.memory_space<vmem>>, %arg5: memref<1x1xf32, #tpu.memory_space<vmem>>, %arg6: memref<16x2xf32, #tpu.memory_space<vmem>>) attributes {dimension_semantics = [#tpu.dimension_semantics<parallel>], iteration_bounds = array<i64: 1>, scalar_prefetch = 0 : i64, scratch_operands = 0 : i64, tpu.core_type = #tpu.core_type<tc>, window_params = [{transform_indices = @transform_0, window_bounds = array<i64: 16, 32>}, {pipeline_mode = #tpu.pipeline_mode<synchronous>, transform_indices = @transform_1, window_bounds = array<i64: 32, 128>}, {pipeline_mode = #tpu.pipeline_mode<synchronous>, transform_indices = @transform_2, window_bounds = array<i64: 1, 128>}, {pipeline_mode = #tpu.pipeline_mode<synchronous>, transform_indices = @transform_3, window_bounds = array<i64: 1, 128>}, {pipeline_mode = #tpu.pipeline_mode<synchronous>, transform_indices = @transform_4, window_bounds = array<i64: 1, 1>}, {transform_indices = @transform_5, window_bounds = array<i64: 16, 2>}]} {
    %c0 = arith.constant 0 : index
    %c0_0 = arith.constant 0 : index
    %0 = vector.load %arg1[%c0, %c0_0] : memref<16x32xf32, #tpu.memory_space<vmem>>, vector<16x32xf32>
    %1 = arith.truncf %0 : vector<16x32xf32> to vector<16x32xbf16>
    %c0_1 = arith.constant 0 : index
    %c0_2 = arith.constant 0 : index
    %2 = vector.load %arg2[%c0_1, %c0_2] : memref<32x128xbf16, #tpu.memory_space<vmem>>, vector<32x128xbf16>
    %cst = arith.constant dense<0.000000e+00> : vector<16x128xf32>
    %3 = tpu.matmul %1, %2, %cst {dimension_numbers = #tpu.dot_dimension_numbers<[1], [0], [0], [1], [0, 0, 1, 1], [], []>} : vector<16x32xbf16>, vector<32x128xbf16>, vector<16x128xf32> -> vector<16x128xf32>
    %c0_3 = arith.constant 0 : index
    %c0_4 = arith.constant 0 : index
    %4 = vector.load %arg3[%c0_3, %c0_4] : memref<1x128xf32, #tpu.memory_space<vmem>>, vector<1x128xf32>
    %5 = vector.broadcast %4 : vector<1x128xf32> to vector<16x128xf32>
    %6 = arith.addf %3, %5 : vector<16x128xf32>
    %cst_5 = arith.constant 0.000000e+00 : f32
    %7 = vector.broadcast %cst_5 : f32 to vector<16x128xf32>
    %8 = arith.maximumf %6, %7 : vector<16x128xf32>
    %c0_6 = arith.constant 0 : index
    %c0_7 = arith.constant 0 : index
    %9 = vector.load %arg4[%c0_6, %c0_7] : memref<1x128xf32, #tpu.memory_space<vmem>>, vector<1x128xf32>
    %10 = vector.broadcast %9 : vector<1x128xf32> to vector<16x128xf32>
    %11 = arith.mulf %8, %10 : vector<16x128xf32>
    %cst_8 = arith.constant dense<0.000000e+00> : vector<16xf32>
    %12 = vector.multi_reduction <add>, %11, %cst_8 [1] : vector<16x128xf32> to vector<16xf32>
    %13 = vector.shape_cast %12 : vector<16xf32> to vector<16x1xf32>
    %c0_9 = arith.constant 0 : index
    %c0_10 = arith.constant 0 : index
    %14 = vector.load %arg5[%c0_9, %c0_10] : memref<1x1xf32, #tpu.memory_space<vmem>>, vector<1x1xf32>
    %15 = vector.broadcast %14 : vector<1x1xf32> to vector<16x1xf32>
    %16 = arith.addf %13, %15 : vector<16x1xf32>
    %cst_11 = arith.constant 0.000000e+00 : f32
    %17 = vector.broadcast %cst_11 : f32 to vector<16x1xf32>
    %18 = arith.subf %17, %16 : vector<16x1xf32>
    %19 = math.exp %18 : vector<16x1xf32>
    %cst_12 = arith.constant 1.000000e+00 : f32
    %20 = vector.broadcast %cst_12 : f32 to vector<16x1xf32>
    %21 = arith.addf %20, %19 : vector<16x1xf32>
    %22 = tpu.reciprocal %21 {approx = true} : vector<16x1xf32> -> vector<16x1xf32>
    %23 = vector.shape_cast %22 : vector<16x1xf32> to vector<16x1xf32>
    %24 = vector.broadcast %23 : vector<16x1xf32> to vector<16x2xf32>
    %25 = tpu.iota {dimensions = array<i32: 1>} : vector<16x2xi32>
    %c0_i32 = arith.constant 0 : i32
    %26 = vector.broadcast %c0_i32 : i32 to vector<16x2xi32>
    %27 = arith.cmpi eq, %25, %26 : vector<16x2xi32>
    %cst_13 = arith.constant 1.000000e+00 : f32
    %28 = vector.broadcast %cst_13 : f32 to vector<16x2xf32>
    %29 = arith.subf %28, %24 : vector<16x2xf32>
    %30 = arith.select %27, %29, %24 : vector<16x2xi1>, vector<16x2xf32>
    %c0_14 = arith.constant 0 : index
    %c0_15 = arith.constant 0 : index
    %31 = vector.load %arg6[%c0_14, %c0_15] : memref<16x2xf32, #tpu.memory_space<vmem>>, vector<16x2xf32>
    tpu.vector_store %arg6[%c0_14, %c0_15], %30 {strides = array<i32>} : memref<16x2xf32, #tpu.memory_space<vmem>>, vector<16x2xf32>,
    return
  }
  func.func @transform_0(%arg0: i32) -> (i32, i32) {
    %c0_i32 = arith.constant 0 : i32
    %c0_i32_0 = arith.constant 0 : i32
    return %arg0, %c0_i32 : i32, i32
  }
  func.func @transform_1(%arg0: i32) -> (i32, i32) {
    %c0_i32 = arith.constant 0 : i32
    %c0_i32_0 = arith.constant 0 : i32
    %c0_i32_1 = arith.constant 0 : i32
    return %c0_i32, %c0_i32_0 : i32, i32
  }
  func.func @transform_2(%arg0: i32) -> (i32, i32) {
    %c0_i32 = arith.constant 0 : i32
    %c0_i32_0 = arith.constant 0 : i32
    %c0_i32_1 = arith.constant 0 : i32
    return %c0_i32, %c0_i32_0 : i32, i32
  }
  func.func @transform_3(%arg0: i32) -> (i32, i32) {
    %c0_i32 = arith.constant 0 : i32
    %c0_i32_0 = arith.constant 0 : i32
    %c0_i32_1 = arith.constant 0 : i32
    return %c0_i32, %c0_i32_0 : i32, i32
  }
  func.func @transform_4(%arg0: i32) -> (i32, i32) {
    %c0_i32 = arith.constant 0 : i32
    %c0_i32_0 = arith.constant 0 : i32
    %c0_i32_1 = arith.constant 0 : i32
    return %c0_i32, %c0_i32_0 : i32, i32
  }
  func.func @transform_5(%arg0: i32) -> (i32, i32) {
    %c0_i32 = arith.constant 0 : i32
    %c0_i32_0 = arith.constant 0 : i32
    return %arg0, %c0_i32 : i32, i32
  }
}

</mosaic_0001>

<bundles_post_ra>
// kernel: tpu_custom_call.1
= control target key start
LH: loop header
LB: loop body
LE: loop exit
PB: predicated region body
PF: predicated region fallthrough
CT: control target
= control target key end

     0   :  { %s346_s0 = inlined_call_operand.hbm [shape: f32[16,32], index: 0, kind: input, shape index: {}]   ;;  %s347_s1 = inlined_call_operand.hbm [shape: bf16[32,128], index: 1, kind: input, shape index: {}]   ;;  %s348_s2 = inlined_call_operand.vmem [shape: f32[1,128], index: 2, kind: input, shape index: {}]   ;;  %s349_s3 = inlined_call_operand.vmem [shape: f32[1,128], index: 3, kind: input, shape index: {}]   ;;  %s350_s4 = inlined_call_operand.<no memory space> [shape: f32[1,1], index: 4, kind: input, shape index: {}]   ;;  %s351_s5 = inlined_call_operand.vmem [shape: f32[16,2], index: 5, kind: output, shape index: {}]  }
   0x1   :  { %v10_v0 = vstv %s350_s4 }
   0x2   :  { %11 = vst [vmem:[#allocation2] sm:$0x1] %v10_v0 }
   0x3   :  { %12 = vsyncpa [#allocation4], 0 }
   0x4   :  { %13 = vsyncpa [#allocation6], 0  ;;  %s268_s20 = smov [#allocation3]   ;;  %s220_s24 = scalar_lea.hbm %s346_s0, 256 }
   0x5   :  { %s19_s21 = sshll.u32 %s268_s20, 4  ;;  %p221_p0 = scmp.ne.s32.totalorder %s346_s0, %s220_s24  ;;  %s20_s21 = int_to_ptr.vmem [resolvable:$true] %s19_s21 }
   0x6   :  { %p224_p1 = scmp.lt.u32.totalorder %s220_s24, %s346_s0 }
   0x8   :  { %p226_p2 = pnand %p224_p1, %p221_p0 }
   0xa   :  { %229 = shalt.err (!%p226_p2)
}
   0xb   :  { %s230_s4 = scalar_lea.vmem %s20_s21, 256  ;;  %p235_p4 = scmp.lt.s32.totalorder %s20_s21, %s20_s21 }
   0xc   :  { %p231_p3 = scmp.ne.s32.totalorder %s20_s21, %s230_s4  ;;  %p236_p5 = scmp.lt.s32.totalorder %s230_s4, %s230_s4 }
   0xe   :  { %p237_p6 = por %p236_p5, %p235_p4 }
  0x10   :  { %p238_p7 = pnand %p237_p6, %p231_p3 }
  0x12   :  { %241 = shalt.err (!%p238_p7)
}
  0x13   :  { %s269_s29 = smov 128   ;;  %s270_s30 = smov 8  }
  0x14   :  { %25 = dma.hbm_to_vmem [thread:$0]  %s346_s0, 256, %s20_s21, [#allocation4], %s269_s29, %s269_s29, %s270_s30  }
  0x15   :  { %s271_s8 = smov [#allocation5]   ;;  %s242_s12 = scalar_lea.hbm %s347_s1, 256 }
  0x16   :  { %s31_s9 = sshll.u32 %s271_s8, 4  ;;  %p243_p8 = scmp.ne.s32.totalorder %s347_s1, %s242_s12  ;;  %s32_s9 = int_to_ptr.vmem [resolvable:$true] %s31_s9 }
  0x17   :  { %p246_p9 = scmp.lt.u32.totalorder %s242_s12, %s347_s1 }
  0x19   :  { %p248_p10 = pnand %p246_p9, %p243_p8 }
  0x1b   :  { %251 = shalt.err (!%p248_p10)
}
  0x1c   :  { %s252_s17 = scalar_lea.vmem %s32_s9, 256  ;;  %p257_p12 = scmp.lt.s32.totalorder %s32_s9, %s32_s9 }
  0x1d   :  { %p253_p11 = scmp.ne.s32.totalorder %s32_s9, %s252_s17  ;;  %p258_p13 = scmp.lt.s32.totalorder %s252_s17, %s252_s17 }
  0x1f   :  { %p259_p0 = por %p258_p13, %p257_p12 }
  0x21   :  { %p260_p1 = pnand %p259_p0, %p253_p11 }
  0x23   :  { %263 = shalt.err (!%p260_p1)
}
  0x24   :  { %s272_s0 = smov 64   ;;  %s273_s18 = smov 4  }
  0x25   :  { %37 = dma.hbm_to_vmem [thread:$0]  %s347_s1, 256, %s32_s9, [#allocation6], %s272_s0, %s272_s0, %s273_s18  }
  0x26   :  { %264 = dma.done.wait [#allocation4], 256  }
  0x27   :  { %265 = vsyncadd [#allocation4], 4294967040 }
  0x28   :  { %266 = dma.done.wait [#allocation6], 256  }
  0x29   :  { %267 = vsyncadd [#allocation6], 4294967040  ;;  %v274_v1 = vmov 0.0   ;;  %vm275_vm0 = vmmov 0   ;;  %v210_v2 = vld [vmem:[#allocation5] sm:$0xff]   ;;  %v211_v3 = vld [vmem:[#allocation5 + $0x8] sm:$0xff]   ;;  %v166_v35 = vlaneseq }
  0x2a   :  { %191 = vmatprep.subr.bf16.mxu0 %v274_v1  ;;  %195 = vmatprep.mubr.msk.bf16.mxu0 %vm275_vm0, %v274_v1  ;;  %v51_v4 = vld [vmem:[#allocation3] sm:$0xff]  ;;  %v52_v5 = vld [vmem:[#allocation3 + $0x8] sm:$0xff]  ;;  %vm77_vm1 = vcmask 261120   ;;  %v182_v7 = vld [vmem:[%s348_s2] ss:$0 sm:$0xff]  ;;  %v276_v19 = vmov 0  }
  0x2b   :  { %192 = vmatpush3.bf16.msra.mxu0 %v210_v2  ;;  %v53_v6 = vpack.c.bf16 %v52_v5, %v51_v4  ;;  %v186_v12 = vld [vmem:[%s349_s3] ss:$0 sm:$0xff]  ;;  %208 = vset.pattern.permute.xlu1 %v276_v19  ;;  %v167_v36 = vand.u32 127, %v166_v35  ;;  %vm173_vm3 = vcmask 15360  }
  0x2c   :  { %193 = vmatprep.subr.bf16.mxu0 %v274_v1  ;;  %209 = vset.pattern.permute.xlu0 %v276_v19  ;;  %v187_v20 = vld [vmem:[#allocation2] ss:$0 sm:$0xff] }
  0x2d   :  { %vm168_vm2 = vcmp.eq.s32.totalorder %v167_v36, 0 }
  0x2f   :  { %194 = vmatpush3.bf16.msra.mxu0 %v211_v3 }
  0x32   :  { %196 = vmatmul.mubr.msk.bf16.vlgmr.msra.gmra.mrb[0].mxu0 %vm77_vm1, %v53_v6 }
 0x105   :  { %v115_v8 = vpop.f32.mrb[0].mxu0 }
 0x106   :  { %v116_v9 = vadd.f32 %v182_v7, %v115_v8  ;;  %v197_v10 = vpop.f32.mrb[1].mxu0 }
 0x107   :  { %v118_v11 = vpop.f32.mrb[2].mxu0 }
 0x108   :  { %v122_v13 = vmax.f32 %v116_v9, 0.0  ;;  %v119_v14 = vadd.f32 %v182_v7, %v118_v11  ;;  %v198_v15 = vpop.f32.mrb[3].mxu0 }
 0x10a   :  { %v123_v16 = vmax.f32 %v119_v14, 0.0  ;;  %v131_v17 = vmul.f32 %v186_v12, %v122_v13 }
 0x10c   :  { %133 = vadd.xlane.f32.xlu0 %v131_v17  ;;  %v132_v18 = vmul.f32 %v186_v12, %v123_v16 }
 0x110   :  { %135 = vadd.xlane.f32.xlu0 %v132_v18 }
 0x199   :  { %v134_v21 = vpop.xlane.xlu0 %133 }
 0x19a   :  { %v144_v22 = vadd.f32 %v187_v20, %v134_v21 }
 0x19c   :  { %v146_v23 = vsub.f32 0.0, %v144_v22 }
 0x19d   :  { %v136_v24 = vpop.xlane.xlu0 %135 }
 0x19e   :  { %v148_v25 = vmul.f32 1.442695, %v146_v23  ;;  %v145_v26 = vadd.f32 %v187_v20, %v136_v24 }
 0x1a0   :  { %212 = vpow2.f32 %v148_v25  ;;  %v147_v27 = vsub.f32 0.0, %v145_v26 }
 0x1a2   :  { %v150_v28 = vmul.f32 1.442695, %v147_v27 }
 0x1a4   :  { %214 = vpow2.f32 %v150_v28 }
 0x1aa   :  { %v213_v29 = vpop.eup %212 }
 0x1ab   :  { %v152_v30 = vadd.f32 1.0, %v213_v29 }
 0x1ad   :  { %216 = vrcp.f32 %v152_v30 }
 0x1ae   :  { %v215_v31 = vpop.eup %214 }
 0x1af   :  { %v153_v32 = vadd.f32 1.0, %v215_v31 }
 0x1b1   :  { %218 = vrcp.f32 %v153_v32 }
 0x1b7   :  { %v217_v33 = vpop.eup %216 }
 0x1b8   :  { %158 = vperm.xlu1 %208, %v217_v33  }
 0x1bb   :  { %v219_v34 = vpop.eup %218 }
 0x1bc   :  { %163 = vperm.xlu1 %208, %v219_v34  }
 0x237   :  { %v159_v37 = vpop.permute.xlu1 %158 }
 0x238   :  { %v169_v38 = vsub.f32 1.0, %v159_v37 }
 0x23a   :  { %v171_v39 = vsel %vm168_vm2, %v169_v38, %v159_v37 }
 0x23b   :  { %174 = vst.msk [vmem:[%s351_s5] sm:$0xff] %vm173_vm3, %v171_v39  ;;  %v164_v40 = vpop.permute.xlu1 %163 }
 0x23c   :  { %v170_v41 = vsub.f32 1.0, %v164_v40 }
 0x23e   :  { %v172_v42 = vsel %vm168_vm2, %v170_v41, %v164_v40 }
 0x23f   :  { %175 = vst.msk [vmem:[%s351_s5 + $0x8] sm:$0xff] %vm173_vm3, %v172_v42 }
 0x240   :  { %180 = vsyncpa [#allocation4], 1 }
 0x241   :  { %181 = vsyncpa [#allocation6], 1 }

</bundles_post_ra>
